<compile_context>
chip_gen: v7x
topology: tpu7x:2x2x1
jax: 0.10.0
libtpu: 0.0.40
codegen_flags: <defaults>
</compile_context>

<pallas_src>
import functools

import jax
import jax.numpy as jnp
from jax.experimental import pallas as pl
from jax.experimental.pallas import tpu as pltpu


def _round_up(n, m):
    return ((n + m - 1) // m) * m


def _pad_cast(a, rows, cols, dtype):
    """Zero-pad a 2-D array to (rows, cols) and cast to dtype."""
    out = jnp.zeros((rows, cols), dtype)
    return out.at[: a.shape[0], : a.shape[1]].set(a.astype(dtype))


def mlp_kernel(x_ref, w1_ref, b1_ref, w2_ref, b2_ref, w3_ref, b3_ref, o_ref):
    # TODO(synk): the torch forward calls `print(x)`; that is a host-side debug
    # print with no numerical effect, so it is not reproduced in-kernel.
    x = x_ref[...]                                   # bf16 (tm, 784)

    # fc1 + relu  (bf16 MXU inputs, f32 accumulate, f32 element-wise path)
    h1 = jnp.dot(x, w1_ref[...], preferred_element_type=jnp.float32) + b1_ref[...]
    h1 = jnp.maximum(h1, 0.0).astype(jnp.bfloat16)

    # fc2 + relu
    h2 = jnp.dot(h1, w2_ref[...], preferred_element_type=jnp.float32) + b2_ref[...]
    h2 = jnp.maximum(h2, 0.0).astype(jnp.bfloat16)

    # fc3 + log_softmax over the (padded) class axis.  Padded class columns are
    # already masked via the pre-masked f32 bias (b3[:, num_classes:] = -1e30),
    # so no iota/where is needed here.
    logits = jnp.dot(h2, w3_ref[...], preferred_element_type=jnp.float32) + b3_ref[...]

    m = jnp.max(logits, axis=-1, keepdims=True)
    shifted = logits - m
    lse = jnp.log(jnp.sum(jnp.exp(shifted), axis=-1, keepdims=True))
    o_ref[...] = shifted - lse                       # lane-dense (tm, 128) store


def prepare_params(params, *, num_classes=10):
    """One-time pad + cast of the weights.  Call once, outside the per-step path.

    Weights -> bf16 (MXU operands), biases -> f32.  Hidden/output feature dims
    are zero-padded to multiples of 128 (500->512, 84->128, 10->128); d_in=784
    is left unpadded (full-array lane dim).  The padded class columns of b3 are
    pre-masked to -1e30 (must stay f32) so the kernel needs no masking.
    """
    w1, b1, w2, b2, w3, b3 = (params[k] for k in ("w1", "b1", "w2", "b2", "w3", "b3"))
    d_in, d_h1 = w1.shape
    d_h2, d_out = w2.shape[1], w3.shape[1]
    d_h1_p = _round_up(d_h1, 128)     # 500 -> 512
    d_h2_p = _round_up(d_h2, 128)     # 84  -> 128
    d_out_p = _round_up(d_out, 128)   # 10  -> 128

    b3p = _pad_cast(b3, 1, d_out_p, jnp.float32)
    col = jnp.arange(d_out_p)[None, :]
    b3p = jnp.where(col < num_classes, b3p, jnp.float32(-1e30))

    return {
        "w1": _pad_cast(w1, d_in, d_h1_p, jnp.bfloat16),     # (784, 512)
        "b1": _pad_cast(b1, 1, d_h1_p, jnp.float32),
        "w2": _pad_cast(w2, d_h1_p, d_h2_p, jnp.bfloat16),   # (512, 128)
        "b2": _pad_cast(b2, 1, d_h2_p, jnp.float32),
        "w3": _pad_cast(w3, d_h2_p, d_out_p, jnp.bfloat16),  # (128, 128)
        "b3": b3p,                                           # f32, pre-masked
    }


def _choose_tm(B, tm_max):
    """Batch tile size: single tile for small batches; otherwise a multiple of
    256 (v6e/v7x MXU) or 128 (v5e floor) that keeps pad waste low and mildly
    prefers an even grid length (v7x has 2 TensorCores)."""
    if B <= tm_max:
        return _round_up(B, 8)
    best, best_cost = None, None
    for tm in (512, 256, 128):
        if tm > tm_max:
            continue
        n = -(-B // tm)
        waste = n * tm - B
        odd_penalty = tm if (n > 1 and n % 2 == 1) else 0
        cost = waste + odd_penalty
        if best_cost is None or cost < best_cost:
            best, best_cost = tm, cost
    return best if best is not None else _round_up(tm_max, 8)


def net_forward(x, prepped, *, tm=512, num_classes=10):
    """x: (B, 784) float32. prepped: output of prepare_params. Returns (B, 10) log-probs."""
    w1, b1, w2, b2, w3, b3 = (prepped[k] for k in ("w1", "b1", "w2", "b2", "w3", "b3"))
    B, d_in = x.shape
    assert d_in == w1.shape[0]
    d_h1_p, d_h2_p, d_out_p = w1.shape[1], w2.shape[1], w3.shape[1]

    tm = _choose_tm(B, tm)
    b_pad = _round_up(B, tm)

    # Per-call work: bf16 cast of x and (only if needed) batch padding.
    xp = x.astype(jnp.bfloat16)
    if b_pad != B:
        xp = jnp.pad(xp, ((0, b_pad - B), (0, 0)))

    grid = (b_pad // tm,)
    full = lambda shape: pl.BlockSpec(shape, lambda i: (0,) * len(shape))

    cost = pl.CostEstimate(
        flops=2 * b_pad * (d_in * d_h1_p + d_h1_p * d_h2_p + d_h2_p * d_out_p),
        transcendentals=b_pad * d_out_p,  # exp in log-softmax
        bytes_accessed=(
            2 * (d_in * d_h1_p + d_h1_p * d_h2_p + d_h2_p * d_out_p)  # bf16 weights
            + 4 * (d_h1_p + d_h2_p + d_out_p)                          # f32 biases
            + 2 * b_pad * d_in                                         # bf16 x
            + 4 * b_pad * d_out_p                                      # f32 out
        ),
    )

    out_padded = pl.pallas_call(
        mlp_kernel,
        out_shape=jax.ShapeDtypeStruct((b_pad, d_out_p), jnp.float32),
        grid=grid,
        in_specs=[
            pl.BlockSpec((tm, d_in), lambda i: (i, 0)),     # x tile over batch
            full((d_in, d_h1_p)),                           # w1 (whole, resident)
            full((1, d_h1_p)),                              # b1
            full((d_h1_p, d_h2_p)),                         # w2
            full((1, d_h2_p)),                              # b2
            full((d_h2_p, d_out_p)),                        # w3
            full((1, d_out_p)),                             # b3 (f32, pre-masked)
        ],
        out_specs=pl.BlockSpec((tm, d_out_p), lambda i: (i, 0)),
        compiler_params=pltpu.CompilerParams(
            dimension_semantics=("parallel",),
        ),
        cost_estimate=cost,
    )(xp, w1, b1, w2, b2, w3, b3)

    return out_padded[:B, :num_classes]


def init_params(key):
    """Deterministic init mimicking torch.nn.Linear: U(-1/sqrt(fan_in), 1/sqrt(fan_in))."""
    dims = [(784, 500), (500, 84), (84, 10)]
    params = {}
    for idx, (fan_in, fan_out) in enumerate(dims, start=1):
        key, kw, kb = jax.random.split(key, 3)
        bound = 1.0 / (fan_in ** 0.5)
        params[f"w{idx}"] = jax.random.uniform(
            kw, (fan_in, fan_out), jnp.float32, minval=-bound, maxval=bound)
        params[f"b{idx}"] = jax.random.uniform(
            kb, (1, fan_out), jnp.float32, minval=-bound, maxval=bound)
    return params


def _reference(x, params):
    """Pure-JAX f32 reference of the torch forward (for sanity checking)."""
    h1 = jnp.maximum(x @ params["w1"] + params["b1"], 0.0)
    h2 = jnp.maximum(h1 @ params["w2"] + params["b2"], 0.0)
    logits = h2 @ params["w3"] + params["b3"]
    return jax.nn.log_softmax(logits, axis=-1)


if __name__ == "__main__":
    key = jax.random.PRNGKey(0)
    key, kx = jax.random.split(key)

    B = 16  # small batch -> single grid step (grid=(1,)), whole batch per tile
    x = jax.random.normal(kx, (B, 784), dtype=jnp.float32)
    params = init_params(key)

    # One-time weight prep (pad + bf16 cast + bias pre-mask) outside the call path.
    prepped = jax.tree_util.tree_map(jax.block_until_ready, prepare_params(params))

    out = net_forward(x, prepped)
    out = jax.block_until_ready(out)

    # sanity: shape, log-softmax rows sum (in prob space) to ~1, and match f32 ref
    assert out.shape == (B, 10)
    row_sums = jnp.exp(out).sum(axis=-1)
    assert bool(jnp.all(jnp.abs(row_sums - 1.0) < 1e-4))
    ref = _reference(x, params)
    assert bool(jnp.max(jnp.abs(out - ref)) < 0.1)  # loose tol: bf16 dot inputs

    print("KERNEL_OK")
</pallas_src>

<mosaic_0001>
module attributes {stable_mosaic.version = 11 : i64} {
  func.func @mlp_kernel(%arg0: i32, %arg1: memref<16x784xbf16, #tpu.memory_space<vmem>>, %arg2: memref<784x512xbf16, #tpu.memory_space<vmem>>, %arg3: memref<1x512xf32, #tpu.memory_space<vmem>>, %arg4: memref<512x128xbf16, #tpu.memory_space<vmem>>, %arg5: memref<1x128xf32, #tpu.memory_space<vmem>>, %arg6: memref<128x128xbf16, #tpu.memory_space<vmem>>, %arg7: memref<1x128xf32, #tpu.memory_space<vmem>>, %arg8: memref<16x128xf32, #tpu.memory_space<vmem>>) attributes {dimension_semantics = [#tpu.dimension_semantics<parallel>], iteration_bounds = array<i64: 1>, scalar_prefetch = 0 : i64, scratch_operands = 0 : i64, tpu.core_type = #tpu.core_type<tc>, window_params = [{transform_indices = @transform_0, window_bounds = array<i64: 16, 784>}, {pipeline_mode = #tpu.pipeline_mode<synchronous>, transform_indices = @transform_1, window_bounds = array<i64: 784, 512>}, {pipeline_mode = #tpu.pipeline_mode<synchronous>, transform_indices = @transform_2, window_bounds = array<i64: 1, 512>}, {pipeline_mode = #tpu.pipeline_mode<synchronous>, transform_indices = @transform_3, window_bounds = array<i64: 512, 128>}, {pipeline_mode = #tpu.pipeline_mode<synchronous>, transform_indices = @transform_4, window_bounds = array<i64: 1, 128>}, {pipeline_mode = #tpu.pipeline_mode<synchronous>, transform_indices = @transform_5, window_bounds = array<i64: 128, 128>}, {pipeline_mode = #tpu.pipeline_mode<synchronous>, transform_indices = @transform_6, window_bounds = array<i64: 1, 128>}, {transform_indices = @transform_7, window_bounds = array<i64: 16, 128>}]} {
    %c0 = arith.constant 0 : index
    %c0_0 = arith.constant 0 : index
    %0 = vector.load %arg1[%c0, %c0_0] : memref<16x784xbf16, #tpu.memory_space<vmem>>, vector<16x784xbf16>
    %c0_1 = arith.constant 0 : index
    %c0_2 = arith.constant 0 : index
    %1 = vector.load %arg2[%c0_1, %c0_2] : memref<784x512xbf16, #tpu.memory_space<vmem>>, vector<784x512xbf16>
    %cst = arith.constant dense<0.000000e+00> : vector<16x512xf32>
    %2 = tpu.matmul %0, %1, %cst {dimension_numbers = #tpu.dot_dimension_numbers<[1], [0], [0], [1], [0, 0, 1, 1], [], []>} : vector<16x784xbf16>, vector<784x512xbf16>, vector<16x512xf32> -> vector<16x512xf32>
    %c0_3 = arith.constant 0 : index
    %c0_4 = arith.constant 0 : index
    %3 = vector.load %arg3[%c0_3, %c0_4] : memref<1x512xf32, #tpu.memory_space<vmem>>, vector<1x512xf32>
    %4 = vector.broadcast %3 : vector<1x512xf32> to vector<16x512xf32>
    %5 = arith.addf %2, %4 : vector<16x512xf32>
    %cst_5 = arith.constant 0.000000e+00 : f32
    %6 = vector.broadcast %cst_5 : f32 to vector<16x512xf32>
    %7 = arith.maximumf %5, %6 : vector<16x512xf32>
    %8 = arith.truncf %7 : vector<16x512xf32> to vector<16x512xbf16>
    %c0_6 = arith.constant 0 : index
    %c0_7 = arith.constant 0 : index
    %9 = vector.load %arg4[%c0_6, %c0_7] : memref<512x128xbf16, #tpu.memory_space<vmem>>, vector<512x128xbf16>
    %cst_8 = arith.constant dense<0.000000e+00> : vector<16x128xf32>
    %10 = tpu.matmul %8, %9, %cst_8 {dimension_numbers = #tpu.dot_dimension_numbers<[1], [0], [0], [1], [0, 0, 1, 1], [], []>} : vector<16x512xbf16>, vector<512x128xbf16>, vector<16x128xf32> -> vector<16x128xf32>
    %c0_9 = arith.constant 0 : index
    %c0_10 = arith.constant 0 : index
    %11 = vector.load %arg5[%c0_9, %c0_10] : memref<1x128xf32, #tpu.memory_space<vmem>>, vector<1x128xf32>
    %12 = vector.broadcast %11 : vector<1x128xf32> to vector<16x128xf32>
    %13 = arith.addf %10, %12 : vector<16x128xf32>
    %cst_11 = arith.constant 0.000000e+00 : f32
    %14 = vector.broadcast %cst_11 : f32 to vector<16x128xf32>
    %15 = arith.maximumf %13, %14 : vector<16x128xf32>
    %16 = arith.truncf %15 : vector<16x128xf32> to vector<16x128xbf16>
    %c0_12 = arith.constant 0 : index
    %c0_13 = arith.constant 0 : index
    %17 = vector.load %arg6[%c0_12, %c0_13] : memref<128x128xbf16, #tpu.memory_space<vmem>>, vector<128x128xbf16>
    %cst_14 = arith.constant dense<0.000000e+00> : vector<16x128xf32>
    %18 = tpu.matmul %16, %17, %cst_14 {dimension_numbers = #tpu.dot_dimension_numbers<[1], [0], [0], [1], [0, 0, 1, 1], [], []>} : vector<16x128xbf16>, vector<128x128xbf16>, vector<16x128xf32> -> vector<16x128xf32>
    %c0_15 = arith.constant 0 : index
    %c0_16 = arith.constant 0 : index
    %19 = vector.load %arg7[%c0_15, %c0_16] : memref<1x128xf32, #tpu.memory_space<vmem>>, vector<1x128xf32>
    %20 = vector.broadcast %19 : vector<1x128xf32> to vector<16x128xf32>
    %21 = arith.addf %18, %20 : vector<16x128xf32>
    %cst_17 = arith.constant dense<0xFF800000> : vector<16xf32>
    %22 = vector.multi_reduction <maximumf>, %21, %cst_17 [1] : vector<16x128xf32> to vector<16xf32>
    %23 = vector.shape_cast %22 : vector<16xf32> to vector<16x1xf32>
    %24 = vector.broadcast %23 : vector<16x1xf32> to vector<16x128xf32>
    %25 = arith.subf %21, %24 : vector<16x128xf32>
    %26 = math.exp %25 : vector<16x128xf32>
    %cst_18 = arith.constant dense<0.000000e+00> : vector<16xf32>
    %27 = vector.multi_reduction <add>, %26, %cst_18 [1] : vector<16x128xf32> to vector<16xf32>
    %28 = vector.shape_cast %27 : vector<16xf32> to vector<16x1xf32>
    %29 = math.log %28 : vector<16x1xf32>
    %30 = vector.broadcast %29 : vector<16x1xf32> to vector<16x128xf32>
    %31 = arith.subf %25, %30 : vector<16x128xf32>
    %c0_19 = arith.constant 0 : index
    %c0_20 = arith.constant 0 : index
    %32 = vector.load %arg8[%c0_19, %c0_20] : memref<16x128xf32, #tpu.memory_space<vmem>>, vector<16x128xf32>
    tpu.vector_store %arg8[%c0_19, %c0_20], %31 {strides = array<i32>} : memref<16x128xf32, #tpu.memory_space<vmem>>, vector<16x128xf32>,
    return
  }
  func.func @transform_0(%arg0: i32) -> (i32, i32) {
    %c0_i32 = arith.constant 0 : i32
    %c0_i32_0 = arith.constant 0 : i32
    return %arg0, %c0_i32 : i32, i32
  }
  func.func @transform_1(%arg0: i32) -> (i32, i32) {
    %c0_i32 = arith.constant 0 : i32
    %c0_i32_0 = arith.constant 0 : i32
    %c0_i32_1 = arith.constant 0 : i32
    return %c0_i32, %c0_i32_0 : i32, i32
  }
  func.func @transform_2(%arg0: i32) -> (i32, i32) {
    %c0_i32 = arith.constant 0 : i32
    %c0_i32_0 = arith.constant 0 : i32
    %c0_i32_1 = arith.constant 0 : i32
    return %c0_i32, %c0_i32_0 : i32, i32
  }
  func.func @transform_3(%arg0: i32) -> (i32, i32) {
    %c0_i32 = arith.constant 0 : i32
    %c0_i32_0 = arith.constant 0 : i32
    %c0_i32_1 = arith.constant 0 : i32
    return %c0_i32, %c0_i32_0 : i32, i32
  }
  func.func @transform_4(%arg0: i32) -> (i32, i32) {
    %c0_i32 = arith.constant 0 : i32
    %c0_i32_0 = arith.constant 0 : i32
    %c0_i32_1 = arith.constant 0 : i32
    return %c0_i32, %c0_i32_0 : i32, i32
  }
  func.func @transform_5(%arg0: i32) -> (i32, i32) {
    %c0_i32 = arith.constant 0 : i32
    %c0_i32_0 = arith.constant 0 : i32
    %c0_i32_1 = arith.constant 0 : i32
    return %c0_i32, %c0_i32_0 : i32, i32
  }
  func.func @transform_6(%arg0: i32) -> (i32, i32) {
    %c0_i32 = arith.constant 0 : i32
    %c0_i32_0 = arith.constant 0 : i32
    %c0_i32_1 = arith.constant 0 : i32
    return %c0_i32, %c0_i32_0 : i32, i32
  }
  func.func @transform_7(%arg0: i32) -> (i32, i32) {
    %c0_i32 = arith.constant 0 : i32
    %c0_i32_0 = arith.constant 0 : i32
    return %arg0, %c0_i32 : i32, i32
  }
}

</mosaic_0001>

<bundles_post_ra>
// kernel: tpu_custom_call.1
= control target key start
LH: loop header
LB: loop body
LE: loop exit
PB: predicated region body
PF: predicated region fallthrough
CT: control target
= control target key end

     0   :  { %12 = vsyncpa [#allocation3], 0  ;;  %s3162_s0 = inlined_call_operand.hbm [shape: bf16[16,784], index: 0, kind: input, shape index: {}]   ;;  %s3163_s1 = inlined_call_operand.hbm [shape: bf16[784,512], index: 1, kind: input, shape index: {}]   ;;  %s3164_s2 = inlined_call_operand.vmem [shape: f32[1,512], index: 2, kind: input, shape index: {}]   ;;  %s3165_s3 = inlined_call_operand.hbm [shape: bf16[512,128], index: 3, kind: input, shape index: {}]   ;;  %s3166_s4 = inlined_call_operand.vmem [shape: f32[1,128], index: 4, kind: input, shape index: {}]   ;;  %s3167_s5 = inlined_call_operand.hbm [shape: bf16[128,128], index: 5, kind: input, shape index: {}]   ;;  %s3168_s6 = inlined_call_operand.vmem [shape: f32[1,128], index: 6, kind: input, shape index: {}]   ;;  %s3169_s7 = inlined_call_operand.hbm [shape: f32[16,128], index: 7, kind: output, shape index: {}]  }
   0x1   :  { %13 = vsyncpa [#allocation6], 0 }
   0x2   :  { %14 = vsyncpa [#allocation9], 0 }
   0x3   :  { %15 = vsyncpa [#allocation4], 0  ;;  %s3024_s24 = smov [#allocation5]   ;;  %s2906_s28 = scalar_lea.hbm %s3163_s1, 25088 }
   0x4   :  { %s33_s25 = sshll.u32 %s3024_s24, 4  ;;  %p2907_p0 = scmp.ne.s32.totalorder %s3163_s1, %s2906_s28  ;;  %s34_s25 = int_to_ptr.vmem [resolvable:$true] %s33_s25 }
   0x5   :  { %p2910_p1 = scmp.lt.u32.totalorder %s2906_s28, %s3163_s1 }
   0x7   :  { %p2912_p2 = pnand %p2910_p1, %p2907_p0 }
   0x9   :  { %2915 = shalt.err (!%p2912_p2)
}
   0xa   :  { %s2916_s10 = scalar_lea.vmem %s34_s25, 25088  ;;  %p2921_p4 = scmp.lt.s32.totalorder %s34_s25, %s34_s25 }
   0xb   :  { %p2917_p3 = scmp.ne.s32.totalorder %s34_s25, %s2916_s10  ;;  %p2922_p5 = scmp.lt.s32.totalorder %s2916_s10, %s2916_s10 }
   0xd   :  { %p2923_p6 = por %p2922_p5, %p2921_p4 }
   0xf   :  { %p2924_p7 = pnand %p2923_p6, %p2917_p3 }
  0x11   :  { %2927 = shalt.err (!%p2924_p7)
}
  0x12   :  { %s3025_s11 = smov 256   ;;  %s3026_s12 = smov 16  }
  0x13   :  { %39 = dma.hbm_to_vmem [thread:$0]  %s3163_s1, 25088, %s34_s25, [#allocation6], %s3025_s11, %s3025_s11, %s3026_s12  }
  0x14   :  { %s3027_s15 = smov [#allocation2]   ;;  %s2928_s19 = scalar_lea.hbm %s3162_s0, 896 }
  0x15   :  { %s21_s16 = sshll.u32 %s3027_s15, 4  ;;  %p2929_p8 = scmp.ne.s32.totalorder %s3162_s0, %s2928_s19  ;;  %s22_s16 = int_to_ptr.vmem [resolvable:$true] %s21_s16 }
  0x16   :  { %p2932_p9 = scmp.lt.u32.totalorder %s2928_s19, %s3162_s0 }
  0x18   :  { %p2934_p10 = pnand %p2932_p9, %p2929_p8 }
  0x1a   :  { %2937 = shalt.err (!%p2934_p10)
}
  0x1b   :  { %s2938_s24 = scalar_lea.vmem %s22_s16, 896  ;;  %p2943_p12 = scmp.lt.s32.totalorder %s22_s16, %s22_s16 }
  0x1c   :  { %p2939_p11 = scmp.ne.s32.totalorder %s22_s16, %s2938_s24  ;;  %p2944_p13 = scmp.lt.s32.totalorder %s2938_s24, %s2938_s24 }
  0x1e   :  { %p2945_p0 = por %p2944_p13, %p2943_p12 }
  0x20   :  { %p2946_p1 = pnand %p2945_p0, %p2939_p11 }
  0x22   :  { %2949 = shalt.err (!%p2946_p1)
}
  0x23   :  { %s3028_s1 = smov 448   ;;  %s3029_s25 = smov 28  }
  0x24   :  { %27 = dma.hbm_to_vmem [thread:$0]  %s3162_s0, 896, %s22_s16, [#allocation3], %s3028_s1, %s3028_s1, %s3029_s25  }
  0x25   :  { %s3030_s28 = smov [#allocation7]   ;;  %s2950_s9 = scalar_lea.hbm %s3165_s3, 4096 }
  0x26   :  { %s47_s29 = sshll.u32 %s3030_s28, 4  ;;  %p2951_p2 = scmp.ne.s32.totalorder %s3165_s3, %s2950_s9  ;;  %s48_s29 = int_to_ptr.vmem [resolvable:$true] %s47_s29 }
  0x27   :  { %p2954_p3 = scmp.lt.u32.totalorder %s2950_s9, %s3165_s3 }
  0x29   :  { %p2956_p4 = pnand %p2954_p3, %p2951_p2 }
  0x2b   :  { %2959 = shalt.err (!%p2956_p4)
}
  0x2c   :  { %s2960_s14 = scalar_lea.vmem %s48_s29, 4096  ;;  %p2965_p6 = scmp.lt.s32.totalorder %s48_s29, %s48_s29 }
  0x2d   :  { %p2961_p5 = scmp.ne.s32.totalorder %s48_s29, %s2960_s14  ;;  %p2966_p7 = scmp.lt.s32.totalorder %s2960_s14, %s2960_s14 }
  0x2f   :  { %p2967_p8 = por %p2966_p7, %p2965_p6 }
  0x31   :  { %p2968_p9 = pnand %p2967_p8, %p2961_p5 }
  0x33   :  { %2971 = shalt.err (!%p2968_p9)
}
  0x34   :  { %s3031_s0 = smov 64   ;;  %s3032_s15 = smov 4  }
  0x35   :  { %53 = dma.hbm_to_vmem [thread:$0]  %s3165_s3, 4096, %s48_s29, [#allocation6], %s3031_s0, %s3031_s0, %s3032_s15  }
  0x36   :  { %s3033_s18 = smov [#allocation8]   ;;  %s2972_s22 = scalar_lea.hbm %s3167_s5, 1024 }
  0x37   :  { %s61_s19 = sshll.u32 %s3033_s18, 4  ;;  %p2973_p10 = scmp.ne.s32.totalorder %s3167_s5, %s2972_s22  ;;  %s62_s19 = int_to_ptr.vmem [resolvable:$true] %s61_s19 }
  0x38   :  { %p2976_p11 = scmp.lt.u32.totalorder %s2972_s22, %s3167_s5 }
  0x3a   :  { %p2978_p12 = pnand %p2976_p11, %p2973_p10 }
  0x3c   :  { %2981 = shalt.err (!%p2978_p12)
}
  0x3d   :  { %s2982_s26 = scalar_lea.vmem %s62_s19, 1024  ;;  %p2987_p0 = scmp.lt.s32.totalorder %s62_s19, %s62_s19 }
  0x3e   :  { %p2983_p13 = scmp.ne.s32.totalorder %s62_s19, %s2982_s26  ;;  %p2988_p1 = scmp.lt.s32.totalorder %s2982_s26, %s2982_s26 }
  0x40   :  { %p2989_p2 = por %p2988_p1, %p2987_p0 }
  0x42   :  { %p2990_p3 = pnand %p2989_p2, %p2983_p13 }
  0x44   :  { %2993 = shalt.err (!%p2990_p3)
}
  0x45   :  { %67 = dma.hbm_to_vmem [thread:$0]  %s3167_s5, 1024, %s62_s19, [#allocation9], %s3031_s0, %s3031_s0, %s3032_s15  }
  0x46   :  { %3016 = dma.done.wait [#allocation3], 896  }
  0x47   :  { %3017 = vsyncadd [#allocation3], 4294966400 }
  0x48   :  { %3018 = dma.done.wait [#allocation6], 29184  }
  0x49   :  { %3019 = vsyncadd [#allocation6], 4294938112 }
  0x4a   :  { %3020 = dma.done.wait [#allocation9], 1024  }
  0x4b   :  { %3021 = vsyncadd [#allocation9], 4294966272  ;;  %v3034_v0 = vmov 0   ;;  %v2553_v1 = vld [vmem:[#allocation5 + $0x4] ss:$16 sps:$4 sm:$0xff]   ;;  %vm1324_vm0 = vcmask 130048  }
  0x4c   :  { %1489 = vmatprep.mubr.bf16.mxu1 %v3034_v0  ;;  %v2555_v2 = vld [vmem:[#allocation5 + $0x604] ss:$16 sps:$4 sm:$0xff]   ;;  %1328 = vmatprep.subr.bf16.mxu0 %v2553_v1  ;;  %v2557_v3 = vld [vmem:[#allocation5] ss:$16 sps:$4 sm:$0xff]   ;;  %v2562_v7 = vld [vmem:[#allocation5 + $0x8] ss:$16 sps:$4 sm:$0xff]  }
  0x4d   :  { %v2558_v4 = vld [vmem:[#allocation5 + $0x600] ss:$16 sps:$4 sm:$0xff]   ;;  %1457 = vmatprep.subr.bf16.mxu1 %v2555_v2  ;;  %v2559_v5 = vld [vmem:[#allocation5 + $0x24] ss:$16 sps:$4 sm:$0xff]   ;;  %1329 = vmatpush1.bf16.msra.mxu0 %v2557_v3  ;;  %v2564_v8 = vld [vmem:[#allocation5 + $0xc] ss:$16 sps:$4 sm:$0xff]  }
  0x4e   :  { %1458 = vmatpush1.bf16.msra.mxu1 %v2558_v4  ;;  %v2561_v6 = vld [vmem:[#allocation2 + $0x18] ss:$28 sps:$4 sm:$0xff]   ;;  %1330 = vmatprep.subr.bf16.mxu0 %v2559_v5  ;;  %v2566_v10 = vld [vmem:[#allocation5 + $0x44] ss:$16 sps:$4 sm:$0xff]   ;;  %v2568_v11 = vld [vmem:[#allocation5 + $0x28] ss:$16 sps:$4 sm:$0xff]  }
  0x4f   :  { %v2565_v9 = vld [vmem:[#allocation5 + $0x20] ss:$16 sps:$4 sm:$0xff]   ;;  %1500 = vmatprep.subr.bf16.mxu1 %v2564_v8  ;;  %v2570_v12 = vld [vmem:[#allocation5 + $0x2c] ss:$16 sps:$4 sm:$0xff]   ;;  %v2572_v14 = vld [vmem:[#allocation5 + $0x64] ss:$16 sps:$4 sm:$0xff]  }
  0x50   :  { %v2571_v13 = vld [vmem:[#allocation5 + $0x40] ss:$16 sps:$4 sm:$0xff]   ;;  %v2574_v15 = vld [vmem:[#allocation5 + $0x48] ss:$16 sps:$4 sm:$0xff]   ;;  %v2576_v16 = vld [vmem:[#allocation5 + $0x4c] ss:$16 sps:$4 sm:$0xff]  }
  0x51   :  { %2388 = vmatmul.mubr.msk.bf16.vlgmr.msra.gmra.mrb[0].mxu1 %vm1324_vm0, %v2561_v6  ;;  %1331 = vmatpush1.bf16.msra.mxu0 %v2565_v9  ;;  %v2577_v17 = vld [vmem:[#allocation5 + $0x60] ss:$16 sps:$4 sm:$0xff]   ;;  %v2578_v18 = vld [vmem:[#allocation5 + $0x84] ss:$16 sps:$4 sm:$0xff]   ;;  %v2582_v19 = vld [vmem:[#allocation5 + $0x6c] ss:$16 sps:$4 sm:$0xff]  }
  0x52   :  { %1501 = vmatpush1.bf16.msra.mxu1 %v2562_v7  ;;  %1332 = vmatprep.subr.bf16.mxu0 %v2566_v10  ;;  %v2580_v20 = vld [vmem:[#allocation5 + $0x68] ss:$16 sps:$4 sm:$0xff]   ;;  %v2583_v21 = vld [vmem:[#allocation5 + $0x80] ss:$16 sps:$4 sm:$0xff]   ;;  %v2584_v22 = vld [vmem:[#allocation5 + $0xa4] ss:$16 sps:$4 sm:$0xff]  }
  0x53   :  { %1502 = vmatprep.subr.bf16.mxu1 %v2570_v12  ;;  %v2588_v23 = vld [vmem:[#allocation5 + $0x8c] ss:$16 sps:$4 sm:$0xff]   ;;  %v2586_v24 = vld [vmem:[#allocation5 + $0x88] ss:$16 sps:$4 sm:$0xff]   ;;  %v2589_v25 = vld [vmem:[#allocation5 + $0xa0] ss:$16 sps:$4 sm:$0xff]  }
  0x54   :  { %v2590_v26 = vld [vmem:[#allocation5 + $0xc4] ss:$16 sps:$4 sm:$0xff]   ;;  %v2594_v27 = vld [vmem:[#allocation5 + $0xac] ss:$16 sps:$4 sm:$0xff]   ;;  %v2592_v28 = vld [vmem:[#allocation5 + $0xa8] ss:$16 sps:$4 sm:$0xff]  }
  0x55   :  { %1333 = vmatpush1.bf16.msra.mxu0 %v2571_v13  ;;  %v2595_v29 = vld [vmem:[#allocation5 + $0xc0] ss:$16 sps:$4 sm:$0xff]   ;;  %v2596_v30 = vld [vmem:[#allocation5 + $0xe4] ss:$16 sps:$4 sm:$0xff]   ;;  %v2600_v31 = vld [vmem:[#allocation5 + $0xcc] ss:$16 sps:$4 sm:$0xff]  }
  0x56   :  { %1503 = vmatpush1.bf16.msra.mxu1 %v2568_v11  ;;  %1334 = vmatprep.subr.bf16.mxu0 %v2572_v14  ;;  %v2598_v32 = vld [vmem:[#allocation5 + $0xc8] ss:$16 sps:$4 sm:$0xff]   ;;  %v2601_v33 = vld [vmem:[#allocation5 + $0xe0] ss:$16 sps:$4 sm:$0xff]   ;;  %v2602_v34 = vld [vmem:[#allocation5 + $0x104] ss:$16 sps:$4 sm:$0xff]  }
  0x57   :  { %1504 = vmatprep.subr.bf16.mxu1 %v2576_v16  ;;  %v2606_v35 = vld [vmem:[#allocation5 + $0xec] ss:$16 sps:$4 sm:$0xff]   ;;  %v2604_v36 = vld [vmem:[#allocation5 + $0xe8] ss:$16 sps:$4 sm:$0xff]   ;;  %v2607_v37 = vld [vmem:[#allocation5 + $0x100] ss:$16 sps:$4 sm:$0xff]  }
  0x58   :  { %v2608_v38 = vld [vmem:[#allocation5 + $0x124] ss:$16 sps:$4 sm:$0xff]   ;;  %v2612_v39 = vld [vmem:[#allocation5 + $0x10c] ss:$16 sps:$4 sm:$0xff]   ;;  %v2610_v40 = vld [vmem:[#allocation5 + $0x108] ss:$16 sps:$4 sm:$0xff]  }
  0x59   :  { %1335 = vmatpush1.bf16.msra.mxu0 %v2577_v17  ;;  %v2613_v41 = vld [vmem:[#allocation5 + $0x120] ss:$16 sps:$4 sm:$0xff]   ;;  %v2614_v42 = vld [vmem:[#allocation5 + $0x144] ss:$16 sps:$4 sm:$0xff]   ;;  %v2618_v43 = vld [vmem:[#allocation5 + $0x12c] ss:$16 sps:$4 sm:$0xff]  }
  0x5a   :  { %1505 = vmatpush1.bf16.msra.mxu1 %v2574_v15  ;;  %1336 = vmatprep.subr.bf16.mxu0 %v2578_v18  ;;  %v2616_v44 = vld [vmem:[#allocation5 + $0x128] ss:$16 sps:$4 sm:$0xff]   ;;  %v2619_v45 = vld [vmem:[#allocation5 + $0x140] ss:$16 sps:$4 sm:$0xff]   ;;  %v2620_v46 = vld [vmem:[#allocation5 + $0x164] ss:$16 sps:$4 sm:$0xff]  }
  0x5b   :  { %1506 = vmatprep.subr.bf16.mxu1 %v2582_v19  ;;  %v2624_v47 = vld [vmem:[#allocation5 + $0x14c] ss:$16 sps:$4 sm:$0xff]   ;;  %v2622_v48 = vld [vmem:[#allocation5 + $0x148] ss:$16 sps:$4 sm:$0xff]   ;;  %v2625_v49 = vld [vmem:[#allocation5 + $0x160] ss:$16 sps:$4 sm:$0xff]  }
  0x5c   :  { %v2626_v50 = vld [vmem:[#allocation5 + $0x184] ss:$16 sps:$4 sm:$0xff]   ;;  %v2652_v51 = vld [vmem:[#allocation2 + $0x4] ss:$28 sps:$4 sm:$0xff]   ;;  %v2631_v54 = vld [vmem:[#allocation5 + $0x180] ss:$16 sps:$4 sm:$0xff]  }
  0x5d   :  { %1337 = vmatpush1.bf16.msra.mxu0 %v2583_v21  ;;  %v2630_v52 = vld [vmem:[#allocation5 + $0x16c] ss:$16 sps:$4 sm:$0xff]   ;;  %1360 = vmatprep.mubr.bf16.mxu0 %v2652_v51  ;;  %v2628_v53 = vld [vmem:[#allocation5 + $0x168] ss:$16 sps:$4 sm:$0xff]   ;;  %v2632_v55 = vld [vmem:[#allocation5 + $0x1a4] ss:$16 sps:$4 sm:$0xff]  }
  0x5e   :  { %1507 = vmatpush1.bf16.msra.mxu1 %v2580_v20  ;;  %1338 = vmatprep.subr.bf16.mxu0 %v2584_v22  ;;  %v2636_v56 = vld [vmem:[#allocation5 + $0x18c] ss:$16 sps:$4 sm:$0xff]   ;;  %v2634_v57 = vld [vmem:[#allocation5 + $0x188] ss:$16 sps:$4 sm:$0xff]   ;;  %v2637_v58 = vld [vmem:[#allocation5 + $0x1a0] ss:$16 sps:$4 sm:$0xff]  }
  0x5f   :  { %1508 = vmatprep.subr.bf16.mxu1 %v2588_v23  ;;  %1532 = vmatprep.mubr.bf16.mxu1 %v2652_v51  ;;  %v2638_v59 = vld [vmem:[#allocation5 + $0x1c4] ss:$16 sps:$4 sm:$0xff]   ;;  %v2642_v60 = vld [vmem:[#allocation5 + $0x1ac] ss:$16 sps:$4 sm:$0xff]   ;;  %v2640_v61 = vld [vmem:[#allocation5 + $0x1a8] ss:$16 sps:$4 sm:$0xff]  }
  0x60   :  { %v2643_v62 = vld [vmem:[#allocation5 + $0x1c0] ss:$16 sps:$4 sm:$0xff]   ;;  %v2644_v63 = vld [vmem:[#allocation5 + $0x1e4] ss:$16 sps:$4 sm:$0xff]   ;;  %v2648_v1 = vld [vmem:[#allocation5 + $0x1cc] ss:$16 sps:$4 sm:$0xff]  }
  0x61   :  { %1339 = vmatpush1.bf16.msra.mxu0 %v2589_v25  ;;  %v2646_v2 = vld [vmem:[#allocation5 + $0x1c8] ss:$16 sps:$4 sm:$0xff]   ;;  %v2649_v3 = vld [vmem:[#allocation5 + $0x1e0] ss:$16 sps:$4 sm:$0xff]   ;;  %v2655_v4 = vld [vmem:[#allocation5 + $0x204] ss:$16 sps:$4 sm:$0xff]  }
  0x62   :  { %1509 = vmatpush1.bf16.msra.mxu1 %v2586_v24  ;;  %1340 = vmatprep.subr.bf16.mxu0 %v2590_v26  ;;  %v2658_v5 = vld [vmem:[#allocation5 + $0x1ec] ss:$16 sps:$4 sm:$0xff]   ;;  %v2650_v6 = vld [vmem:[#allocation2] ss:$28 sps:$4 sm:$0xff]   ;;  %v2653_v7 = vld [vmem:[#allocation5 + $0x200] ss:$16 sps:$4 sm:$0xff]  }
  0x63   :  { %1510 = vmatprep.subr.bf16.mxu1 %v2594_v27  ;;  %v2656_v8 = vld [vmem:[#allocation5 + $0x1e8] ss:$16 sps:$4 sm:$0xff]   ;;  %v2661_v9 = vld [vmem:[#allocation5 + $0x224] ss:$16 sps:$4 sm:$0xff]   ;;  %v2664_v10 = vld [vmem:[#allocation5 + $0x20c] ss:$16 sps:$4 sm:$0xff]  }
  0x64   :  { %v2659_v11 = vld [vmem:[#allocation5 + $0x220] ss:$16 sps:$4 sm:$0xff]   ;;  %v2662_v12 = vld [vmem:[#allocation5 + $0x208] ss:$16 sps:$4 sm:$0xff]   ;;  %v2667_v13 = vld [vmem:[#allocation5 + $0x244] ss:$16 sps:$4 sm:$0xff]  }
  0x65   :  { %1341 = vmatpush1.bf16.msra.mxu0 %v2595_v29  ;;  %v2670_v14 = vld [vmem:[#allocation5 + $0x22c] ss:$16 sps:$4 sm:$0xff]   ;;  %v2665_v15 = vld [vmem:[#allocation5 + $0x240] ss:$16 sps:$4 sm:$0xff]   ;;  %v2668_v16 = vld [vmem:[#allocation5 + $0x228] ss:$16 sps:$4 sm:$0xff]  }
  0x66   :  { %1511 = vmatpush1.bf16.msra.mxu1 %v2592_v28  ;;  %1342 = vmatprep.subr.bf16.mxu0 %v2596_v30  ;;  %v2673_v17 = vld [vmem:[#allocation5 + $0x264] ss:$16 sps:$4 sm:$0xff]   ;;  %v2676_v18 = vld [vmem:[#allocation5 + $0x24c] ss:$16 sps:$4 sm:$0xff]   ;;  %v2671_v19 = vld [vmem:[#allocation5 + $0x260] ss:$16 sps:$4 sm:$0xff]  }
  0x67   :  { %1512 = vmatprep.subr.bf16.mxu1 %v2600_v31  ;;  %v2674_v20 = vld [vmem:[#allocation5 + $0x248] ss:$16 sps:$4 sm:$0xff]   ;;  %v2679_v21 = vld [vmem:[#allocation5 + $0x284] ss:$16 sps:$4 sm:$0xff]   ;;  %v2682_v22 = vld [vmem:[#allocation5 + $0x26c] ss:$16 sps:$4 sm:$0xff]  }
  0x68   :  { %v2677_v23 = vld [vmem:[#allocation5 + $0x280] ss:$16 sps:$4 sm:$0xff]   ;;  %v2680_v24 = vld [vmem:[#allocation5 + $0x268] ss:$16 sps:$4 sm:$0xff]   ;;  %v2685_v25 = vld [vmem:[#allocation5 + $0x2a4] ss:$16 sps:$4 sm:$0xff]  }
  0x69   :  { %1343 = vmatpush1.bf16.msra.mxu0 %v2601_v33  ;;  %v2688_v26 = vld [vmem:[#allocation5 + $0x28c] ss:$16 sps:$4 sm:$0xff]   ;;  %v2683_v27 = vld [vmem:[#allocation5 + $0x2a0] ss:$16 sps:$4 sm:$0xff]   ;;  %v2686_v28 = vld [vmem:[#allocation5 + $0x288] ss:$16 sps:$4 sm:$0xff]  }
  0x6a   :  { %1513 = vmatpush1.bf16.msra.mxu1 %v2598_v32  ;;  %1344 = vmatprep.subr.bf16.mxu0 %v2602_v34  ;;  %v2691_v29 = vld [vmem:[#allocation5 + $0x2c4] ss:$16 sps:$4 sm:$0xff]   ;;  %v2694_v30 = vld [vmem:[#allocation5 + $0x2ac] ss:$16 sps:$4 sm:$0xff]   ;;  %v2689_v31 = vld [vmem:[#allocation5 + $0x2c0] ss:$16 sps:$4 sm:$0xff]  }
  0x6b   :  { %1514 = vmatprep.subr.bf16.mxu1 %v2606_v35  ;;  %v2692_v32 = vld [vmem:[#allocation5 + $0x2a8] ss:$16 sps:$4 sm:$0xff]   ;;  %v2697_v33 = vld [vmem:[#allocation5 + $0x2e4] ss:$16 sps:$4 sm:$0xff]   ;;  %v2700_v35 = vld [vmem:[#allocation5 + $0x2cc] ss:$16 sps:$4 sm:$0xff]  }
  0x6c   :  { %v2751_v34 = vld [vmem:[#allocation2 + $0xc] ss:$28 sps:$4 sm:$0xff]   ;;  %v2724_v51 = vld [vmem:[#allocation5 + $0x34c] ss:$16 sps:$4 sm:$0xff]   ;;  %vm3036_vm1 = vmmov 0  }
  0x6d   :  { %1345 = vmatpush1.bf16.msra.mxu0 %v2607_v37  ;;  %v2698_v37 = vld [vmem:[#allocation5 + $0x2c8] ss:$16 sps:$4 sm:$0xff]  }
  0x6e   :  { %1515 = vmatpush1.bf16.msra.mxu1 %v2604_v36  ;;  %1346 = vmatprep.subr.bf16.mxu0 %v2608_v38  ;;  %v2695_v36 = vld [vmem:[#allocation5 + $0x2e0] ss:$16 sps:$4 sm:$0xff]   ;;  %v2703_v38 = vld [vmem:[#allocation5 + $0x304] ss:$16 sps:$4 sm:$0xff]  }
  0x6f   :  { %1516 = vmatprep.subr.bf16.mxu1 %v2612_v39  ;;  %v2706_v39 = vld [vmem:[#allocation5 + $0x2ec] ss:$16 sps:$4 sm:$0xff]  }
  0x71   :  { %1347 = vmatpush1.bf16.msra.mxu0 %v2613_v41  ;;  %v2704_v41 = vld [vmem:[#allocation5 + $0x2e8] ss:$16 sps:$4 sm:$0xff]  }
  0x72   :  { %1517 = vmatpush1.bf16.msra.mxu1 %v2610_v40  ;;  %1348 = vmatprep.subr.bf16.mxu0 %v2614_v42  ;;  %v2701_v40 = vld [vmem:[#allocation5 + $0x300] ss:$16 sps:$4 sm:$0xff]   ;;  %v2709_v42 = vld [vmem:[#allocation5 + $0x324] ss:$16 sps:$4 sm:$0xff]  }
  0x73   :  { %1518 = vmatprep.subr.bf16.mxu1 %v2618_v43  ;;  %v2712_v43 = vld [vmem:[#allocation5 + $0x30c] ss:$16 sps:$4 sm:$0xff]  }
  0x75   :  { %1349 = vmatpush1.bf16.msra.mxu0 %v2619_v45  ;;  %v2710_v45 = vld [vmem:[#allocation5 + $0x308] ss:$16 sps:$4 sm:$0xff]  }
  0x76   :  { %1519 = vmatpush1.bf16.msra.mxu1 %v2616_v44  ;;  %1350 = vmatprep.subr.bf16.mxu0 %v2620_v46  ;;  %v2707_v44 = vld [vmem:[#allocation5 + $0x320] ss:$16 sps:$4 sm:$0xff]   ;;  %v2715_v46 = vld [vmem:[#allocation5 + $0x344] ss:$16 sps:$4 sm:$0xff]  }
  0x77   :  { %1520 = vmatprep.subr.bf16.mxu1 %v2624_v47  ;;  %v2718_v47 = vld [vmem:[#allocation5 + $0x32c] ss:$16 sps:$4 sm:$0xff]  }
  0x79   :  { %1351 = vmatpush1.bf16.msra.mxu0 %v2625_v49  ;;  %v2716_v49 = vld [vmem:[#allocation5 + $0x328] ss:$16 sps:$4 sm:$0xff]  }
  0x7a   :  { %1521 = vmatpush1.bf16.msra.mxu1 %v2622_v48  ;;  %1352 = vmatprep.subr.bf16.mxu0 %v2626_v50  ;;  %v2713_v48 = vld [vmem:[#allocation5 + $0x340] ss:$16 sps:$4 sm:$0xff]   ;;  %v2721_v50 = vld [vmem:[#allocation5 + $0x364] ss:$16 sps:$4 sm:$0xff]  }
  0x7b   :  { %1522 = vmatprep.subr.bf16.mxu1 %v2630_v52  ;;  %v2719_v52 = vld [vmem:[#allocation5 + $0x360] ss:$16 sps:$4 sm:$0xff]  }
  0x7d   :  { %1353 = vmatpush1.bf16.msra.mxu0 %v2631_v54  ;;  %v2727_v54 = vld [vmem:[#allocation5 + $0x384] ss:$16 sps:$4 sm:$0xff]  }
  0x7e   :  { %1523 = vmatpush1.bf16.msra.mxu1 %v2628_v53  ;;  %1354 = vmatprep.subr.bf16.mxu0 %v2632_v55  ;;  %v2722_v53 = vld [vmem:[#allocation5 + $0x348] ss:$16 sps:$4 sm:$0xff]   ;;  %v2730_v55 = vld [vmem:[#allocation5 + $0x36c] ss:$16 sps:$4 sm:$0xff]  }
  0x7f   :  { %1524 = vmatprep.subr.bf16.mxu1 %v2636_v56  ;;  %v2725_v56 = vld [vmem:[#allocation5 + $0x380] ss:$16 sps:$4 sm:$0xff]  }
  0x81   :  { %1355 = vmatpush1.bf16.msra.mxu0 %v2637_v58  ;;  %v2733_v58 = vld [vmem:[#allocation5 + $0x3a4] ss:$16 sps:$4 sm:$0xff]  }
  0x82   :  { %1525 = vmatpush1.bf16.msra.mxu1 %v2634_v57  ;;  %1356 = vmatprep.subr.bf16.mxu0 %v2638_v59  ;;  %v2728_v57 = vld [vmem:[#allocation5 + $0x368] ss:$16 sps:$4 sm:$0xff]   ;;  %v2736_v59 = vld [vmem:[#allocation5 + $0x38c] ss:$16 sps:$4 sm:$0xff]  }
  0x83   :  { %1526 = vmatprep.subr.bf16.mxu1 %v2642_v60  ;;  %v2731_v60 = vld [vmem:[#allocation5 + $0x3a0] ss:$16 sps:$4 sm:$0xff]  }
  0x85   :  { %1357 = vmatpush1.bf16.msra.mxu0 %v2643_v62  ;;  %v2739_v62 = vld [vmem:[#allocation5 + $0x3c4] ss:$16 sps:$4 sm:$0xff]  }
  0x86   :  { %1527 = vmatpush1.bf16.msra.mxu1 %v2640_v61  ;;  %1358 = vmatprep.subr.bf16.mxu0 %v2644_v63  ;;  %v2734_v61 = vld [vmem:[#allocation5 + $0x388] ss:$16 sps:$4 sm:$0xff]   ;;  %v2742_v63 = vld [vmem:[#allocation5 + $0x3ac] ss:$16 sps:$4 sm:$0xff]  }
  0x87   :  { %1528 = vmatprep.subr.bf16.mxu1 %v2648_v1  ;;  %v2737_v1 = vld [vmem:[#allocation5 + $0x3c0] ss:$16 sps:$4 sm:$0xff]  }
  0x89   :  { %1359 = vmatpush1.bf16.msra.mxu0 %v2649_v3  ;;  %v2745_v3 = vld [vmem:[#allocation5 + $0x3e4] ss:$16 sps:$4 sm:$0xff]  }
  0x8a   :  { %1529 = vmatpush1.bf16.msra.mxu1 %v2646_v2  ;;  %1371 = vmatprep.subr.bf16.mxu0 %v2655_v4  ;;  %v2740_v2 = vld [vmem:[#allocation5 + $0x3a8] ss:$16 sps:$4 sm:$0xff]   ;;  %v2748_v4 = vld [vmem:[#allocation5 + $0x3cc] ss:$16 sps:$4 sm:$0xff]  }
  0x8b   :  { %1530 = vmatprep.subr.bf16.mxu1 %v2658_v5  ;;  %v2743_v5 = vld [vmem:[#allocation5 + $0x3e0] ss:$16 sps:$4 sm:$0xff]  }
  0x8c   :  { %1361 = vmatmul.mubr.bf16.vlgmr.msra.gmra.mrb[0].mxu0 %v2650_v6 }
  0x8d   :  { %1372 = vmatpush1.bf16.msra.mxu0 %v2653_v7  ;;  %1403 = vmatprep.mubr.bf16.mxu0 %v2751_v34  ;;  %v2754_v7 = vld [vmem:[#allocation5 + $0x404] ss:$16 sps:$4 sm:$0xff]  }
  0x8e   :  { %1531 = vmatpush1.bf16.msra.mxu1 %v2656_v8  ;;  %1373 = vmatprep.subr.bf16.mxu0 %v2661_v9  ;;  %v2757_v8 = vld [vmem:[#allocation5 + $0x3ec] ss:$16 sps:$4 sm:$0xff]  }
  0x8f   :  { %1543 = vmatprep.subr.bf16.mxu1 %v2664_v10  ;;  %v2749_v9 = vld [vmem:[#allocation2 + $0x8] ss:$28 sps:$4 sm:$0xff]  }
  0x90   :  { %v2752_v10 = vld [vmem:[#allocation5 + $0x400] ss:$16 sps:$4 sm:$0xff]  }
  0x91   :  { %1533 = vmatmul.mubr.bf16.vlgmr.msra.gmra.mrb[4].mxu1 %v2650_v6  ;;  %1374 = vmatpush1.bf16.msra.mxu0 %v2659_v11  ;;  %v2746_v6 = vld [vmem:[#allocation5 + $0x3c8] ss:$16 sps:$4 sm:$0xff]  }
  0x92   :  { %1544 = vmatpush1.bf16.msra.mxu1 %v2662_v12  ;;  %1375 = vmatprep.subr.bf16.mxu0 %v2667_v13  ;;  %v2755_v11 = vld [vmem:[#allocation5 + $0x3e8] ss:$16 sps:$4 sm:$0xff]   ;;  %v2760_v12 = vld [vmem:[#allocation5 + $0x424] ss:$16 sps:$4 sm:$0xff]   ;;  %v2763_v13 = vld [vmem:[#allocation5 + $0x40c] ss:$16 sps:$4 sm:$0xff]  }
  0x93   :  { %1545 = vmatprep.subr.bf16.mxu1 %v2670_v14  ;;  %1575 = vmatprep.mubr.bf16.mxu1 %v2751_v34  ;;  %v2758_v14 = vld [vmem:[#allocation5 + $0x420] ss:$16 sps:$4 sm:$0xff]   ;;  %v2793_v34 = vld [vmem:[#allocation5 + $0x4ac] ss:$16 sps:$4 sm:$0xff]  }
  0x95   :  { %1376 = vmatpush1.bf16.msra.mxu0 %v2665_v15  ;;  %v2761_v15 = vld [vmem:[#allocation5 + $0x408] ss:$16 sps:$4 sm:$0xff]  }
  0x96   :  { %1546 = vmatpush1.bf16.msra.mxu1 %v2668_v16  ;;  %1377 = vmatprep.subr.bf16.mxu0 %v2673_v17  ;;  %v2766_v16 = vld [vmem:[#allocation5 + $0x444] ss:$16 sps:$4 sm:$0xff]   ;;  %v2850_v17 = vld [vmem:[#allocation2 + $0x14] ss:$28 sps:$4 sm:$0xff]  }
  0x97   :  { %1547 = vmatprep.subr.bf16.mxu1 %v2676_v18  ;;  %v2769_v18 = vld [vmem:[#allocation5 + $0x42c] ss:$16 sps:$4 sm:$0xff]  }
  0x99   :  { %1378 = vmatpush1.bf16.msra.mxu0 %v2671_v19  ;;  %v2764_v19 = vld [vmem:[#allocation5 + $0x440] ss:$16 sps:$4 sm:$0xff]  }
  0x9a   :  { %1548 = vmatpush1.bf16.msra.mxu1 %v2674_v20  ;;  %1379 = vmatprep.subr.bf16.mxu0 %v2679_v21  ;;  %v2767_v20 = vld [vmem:[#allocation5 + $0x428] ss:$16 sps:$4 sm:$0xff]   ;;  %v2772_v21 = vld [vmem:[#allocation5 + $0x464] ss:$16 sps:$4 sm:$0xff]  }
  0x9b   :  { %1549 = vmatprep.subr.bf16.mxu1 %v2682_v22  ;;  %v2775_v22 = vld [vmem:[#allocation5 + $0x44c] ss:$16 sps:$4 sm:$0xff]  }
  0x9d   :  { %1380 = vmatpush1.bf16.msra.mxu0 %v2677_v23  ;;  %v2770_v23 = vld [vmem:[#allocation5 + $0x460] ss:$16 sps:$4 sm:$0xff]  }
  0x9e   :  { %1550 = vmatpush1.bf16.msra.mxu1 %v2680_v24  ;;  %1381 = vmatprep.subr.bf16.mxu0 %v2685_v25  ;;  %v2773_v24 = vld [vmem:[#allocation5 + $0x448] ss:$16 sps:$4 sm:$0xff]   ;;  %v2778_v25 = vld [vmem:[#allocation5 + $0x484] ss:$16 sps:$4 sm:$0xff]  }
  0x9f   :  { %1551 = vmatprep.subr.bf16.mxu1 %v2688_v26  ;;  %v2781_v26 = vld [vmem:[#allocation5 + $0x46c] ss:$16 sps:$4 sm:$0xff]  }
  0xa1   :  { %1382 = vmatpush1.bf16.msra.mxu0 %v2683_v27  ;;  %v2776_v27 = vld [vmem:[#allocation5 + $0x480] ss:$16 sps:$4 sm:$0xff]  }
  0xa2   :  { %1552 = vmatpush1.bf16.msra.mxu1 %v2686_v28  ;;  %1383 = vmatprep.subr.bf16.mxu0 %v2691_v29  ;;  %v2779_v28 = vld [vmem:[#allocation5 + $0x468] ss:$16 sps:$4 sm:$0xff]   ;;  %v2784_v29 = vld [vmem:[#allocation5 + $0x4a4] ss:$16 sps:$4 sm:$0xff]  }
  0xa3   :  { %1553 = vmatprep.subr.bf16.mxu1 %v2694_v30  ;;  %v2787_v30 = vld [vmem:[#allocation5 + $0x48c] ss:$16 sps:$4 sm:$0xff]  }
  0xa5   :  { %1384 = vmatpush1.bf16.msra.mxu0 %v2689_v31  ;;  %v2782_v31 = vld [vmem:[#allocation5 + $0x4a0] ss:$16 sps:$4 sm:$0xff]  }
  0xa6   :  { %1554 = vmatpush1.bf16.msra.mxu1 %v2692_v32  ;;  %1385 = vmatprep.subr.bf16.mxu0 %v2697_v33  ;;  %v2785_v32 = vld [vmem:[#allocation5 + $0x488] ss:$16 sps:$4 sm:$0xff]   ;;  %v2790_v33 = vld [vmem:[#allocation5 + $0x4c4] ss:$16 sps:$4 sm:$0xff]  }
  0xa7   :  { %1555 = vmatprep.subr.bf16.mxu1 %v2700_v35  ;;  %v2788_v35 = vld [vmem:[#allocation5 + $0x4c0] ss:$16 sps:$4 sm:$0xff]  }
  0xa9   :  { %1386 = vmatpush1.bf16.msra.mxu0 %v2695_v36  ;;  %v2791_v36 = vld [vmem:[#allocation5 + $0x4a8] ss:$16 sps:$4 sm:$0xff]  }
  0xaa   :  { %1556 = vmatpush1.bf16.msra.mxu1 %v2698_v37  ;;  %1387 = vmatprep.subr.bf16.mxu0 %v2703_v38  ;;  %v2796_v37 = vld [vmem:[#allocation5 + $0x4e4] ss:$16 sps:$4 sm:$0xff]   ;;  %v2799_v38 = vld [vmem:[#allocation5 + $0x4cc] ss:$16 sps:$4 sm:$0xff]  }
  0xab   :  { %1557 = vmatprep.subr.bf16.mxu1 %v2706_v39  ;;  %v2794_v39 = vld [vmem:[#allocation5 + $0x4e0] ss:$16 sps:$4 sm:$0xff]  }
  0xad   :  { %1388 = vmatpush1.bf16.msra.mxu0 %v2701_v40  ;;  %v2797_v40 = vld [vmem:[#allocation5 + $0x4c8] ss:$16 sps:$4 sm:$0xff]  }
  0xae   :  { %1558 = vmatpush1.bf16.msra.mxu1 %v2704_v41  ;;  %1389 = vmatprep.subr.bf16.mxu0 %v2709_v42  ;;  %v2802_v41 = vld [vmem:[#allocation5 + $0x504] ss:$16 sps:$4 sm:$0xff]   ;;  %v2805_v42 = vld [vmem:[#allocation5 + $0x4ec] ss:$16 sps:$4 sm:$0xff]  }
  0xaf   :  { %1559 = vmatprep.subr.bf16.mxu1 %v2712_v43  ;;  %v2800_v43 = vld [vmem:[#allocation5 + $0x500] ss:$16 sps:$4 sm:$0xff]  }
  0xb1   :  { %1390 = vmatpush1.bf16.msra.mxu0 %v2707_v44  ;;  %v2803_v44 = vld [vmem:[#allocation5 + $0x4e8] ss:$16 sps:$4 sm:$0xff]  }
  0xb2   :  { %1560 = vmatpush1.bf16.msra.mxu1 %v2710_v45  ;;  %1391 = vmatprep.subr.bf16.mxu0 %v2715_v46  ;;  %v2808_v45 = vld [vmem:[#allocation5 + $0x524] ss:$16 sps:$4 sm:$0xff]   ;;  %v2811_v46 = vld [vmem:[#allocation5 + $0x50c] ss:$16 sps:$4 sm:$0xff]  }
  0xb3   :  { %1561 = vmatprep.subr.bf16.mxu1 %v2718_v47  ;;  %v2806_v47 = vld [vmem:[#allocation5 + $0x520] ss:$16 sps:$4 sm:$0xff]  }
  0xb5   :  { %1392 = vmatpush1.bf16.msra.mxu0 %v2713_v48  ;;  %v2809_v48 = vld [vmem:[#allocation5 + $0x508] ss:$16 sps:$4 sm:$0xff]  }
  0xb6   :  { %1562 = vmatpush1.bf16.msra.mxu1 %v2716_v49  ;;  %1393 = vmatprep.subr.bf16.mxu0 %v2721_v50  ;;  %v2814_v49 = vld [vmem:[#allocation5 + $0x544] ss:$16 sps:$4 sm:$0xff]   ;;  %v2817_v50 = vld [vmem:[#allocation5 + $0x52c] ss:$16 sps:$4 sm:$0xff]  }
  0xb7   :  { %1563 = vmatprep.subr.bf16.mxu1 %v2724_v51  ;;  %v2812_v51 = vld [vmem:[#allocation5 + $0x540] ss:$16 sps:$4 sm:$0xff]  }
  0xb9   :  { %1394 = vmatpush1.bf16.msra.mxu0 %v2719_v52  ;;  %v2815_v52 = vld [vmem:[#allocation5 + $0x528] ss:$16 sps:$4 sm:$0xff]  }
  0xba   :  { %1564 = vmatpush1.bf16.msra.mxu1 %v2722_v53  ;;  %1395 = vmatprep.subr.bf16.mxu0 %v2727_v54  ;;  %v2820_v53 = vld [vmem:[#allocation5 + $0x564] ss:$16 sps:$4 sm:$0xff]   ;;  %v2823_v54 = vld [vmem:[#allocation5 + $0x54c] ss:$16 sps:$4 sm:$0xff]  }
  0xbb   :  { %1565 = vmatprep.subr.bf16.mxu1 %v2730_v55  ;;  %v2818_v55 = vld [vmem:[#allocation5 + $0x560] ss:$16 sps:$4 sm:$0xff]  }
  0xbd   :  { %1396 = vmatpush1.bf16.msra.mxu0 %v2725_v56  ;;  %v2821_v56 = vld [vmem:[#allocation5 + $0x548] ss:$16 sps:$4 sm:$0xff]  }
  0xbe   :  { %1566 = vmatpush1.bf16.msra.mxu1 %v2728_v57  ;;  %1397 = vmatprep.subr.bf16.mxu0 %v2733_v58  ;;  %v2826_v57 = vld [vmem:[#allocation5 + $0x584] ss:$16 sps:$4 sm:$0xff]   ;;  %v2829_v58 = vld [vmem:[#allocation5 + $0x56c] ss:$16 sps:$4 sm:$0xff]  }
  0xbf   :  { %1567 = vmatprep.subr.bf16.mxu1 %v2736_v59  ;;  %v2824_v59 = vld [vmem:[#allocation5 + $0x580] ss:$16 sps:$4 sm:$0xff]  }
  0xc1   :  { %1398 = vmatpush1.bf16.msra.mxu0 %v2731_v60  ;;  %v2827_v60 = vld [vmem:[#allocation5 + $0x568] ss:$16 sps:$4 sm:$0xff]  }
  0xc2   :  { %1568 = vmatpush1.bf16.msra.mxu1 %v2734_v61  ;;  %1399 = vmatprep.subr.bf16.mxu0 %v2739_v62  ;;  %v2832_v61 = vld [vmem:[#allocation5 + $0x5a4] ss:$16 sps:$4 sm:$0xff]   ;;  %v2835_v62 = vld [vmem:[#allocation5 + $0x58c] ss:$16 sps:$4 sm:$0xff]  }
  0xc3   :  { %1569 = vmatprep.subr.bf16.mxu1 %v2742_v63  ;;  %v2830_v63 = vld [vmem:[#allocation5 + $0x5a0] ss:$16 sps:$4 sm:$0xff]  }
  0xc5   :  { %1400 = vmatpush1.bf16.msra.mxu0 %v2737_v1  ;;  %v2833_v1 = vld [vmem:[#allocation5 + $0x588] ss:$16 sps:$4 sm:$0xff]  }
  0xc6   :  { %1570 = vmatpush1.bf16.msra.mxu1 %v2740_v2  ;;  %1401 = vmatprep.subr.bf16.mxu0 %v2745_v3  ;;  %v2838_v2 = vld [vmem:[#allocation5 + $0x5c4] ss:$16 sps:$4 sm:$0xff]   ;;  %v2841_v3 = vld [vmem:[#allocation5 + $0x5ac] ss:$16 sps:$4 sm:$0xff]  }
  0xc7   :  { %1571 = vmatprep.subr.bf16.mxu1 %v2748_v4  ;;  %v2836_v4 = vld [vmem:[#allocation5 + $0x5c0] ss:$16 sps:$4 sm:$0xff]  }
  0xc9   :  { %1402 = vmatpush1.bf16.msra.mxu0 %v2743_v5  ;;  %v2839_v5 = vld [vmem:[#allocation5 + $0x5a8] ss:$16 sps:$4 sm:$0xff]  }
  0xca   :  { %1572 = vmatpush1.bf16.msra.mxu1 %v2746_v6  ;;  %1414 = vmatprep.subr.bf16.mxu0 %v2754_v7  ;;  %v2844_v6 = vld [vmem:[#allocation5 + $0x5e4] ss:$16 sps:$4 sm:$0xff]   ;;  %v2847_v7 = vld [vmem:[#allocation5 + $0x5cc] ss:$16 sps:$4 sm:$0xff]  }
  0xcb   :  { %1573 = vmatprep.subr.bf16.mxu1 %v2757_v8  ;;  %v2842_v8 = vld [vmem:[#allocation5 + $0x5e0] ss:$16 sps:$4 sm:$0xff]  }
  0xcc   :  { %1404 = vmatmul.mubr.bf16.vlgmr.msra.gmra.mrb[0].mxu0 %v2749_v9 }
  0xcd   :  { %1415 = vmatpush1.bf16.msra.mxu0 %v2752_v10  ;;  %1446 = vmatprep.mubr.bf16.mxu0 %v2850_v17  ;;  %v2853_v10 = vld [vmem:[#allocation5 + $0x5ec] ss:$16 sps:$4 sm:$0xff]  }
  0xce   :  { %1574 = vmatpush1.bf16.msra.mxu1 %v2755_v11  ;;  %1416 = vmatprep.subr.bf16.mxu0 %v2760_v12  ;;  %v2857_v11 = vld [vmem:[#allocation7 + $0x40] sm:$0xff]   ;;  %v2848_v12 = vld [vmem:[#allocation2 + $0x10] ss:$28 sps:$4 sm:$0xff]  }
  0xcf   :  { %1586 = vmatprep.subr.bf16.mxu1 %v2763_v13  ;;  %v2851_v13 = vld [vmem:[#allocation5 + $0x5e8] ss:$16 sps:$4 sm:$0xff]  }
  0xd1   :  { %1576 = vmatmul.mubr.bf16.vlgmr.msra.gmra.mrb[4].mxu1 %v2749_v9  ;;  %1417 = vmatpush1.bf16.msra.mxu0 %v2758_v14  ;;  %v2845_v9 = vld [vmem:[#allocation5 + $0x5c8] ss:$16 sps:$4 sm:$0xff]   ;;  %v2858_v14 = vld [vmem:[#allocation7] sm:$0xff]  }
  0xd2   :  { %1587 = vmatpush1.bf16.msra.mxu1 %v2761_v15  ;;  %1418 = vmatprep.subr.bf16.mxu0 %v2766_v16  ;;  %v2856_v15 = vld [vmem:[#allocation5 + $0x60c] ss:$16 sps:$4 sm:$0xff]  }
  0xd3   :  { %1588 = vmatprep.subr.bf16.mxu1 %v2769_v18  ;;  %1618 = vmatprep.mubr.bf16.mxu1 %v2850_v17  ;;  %v2859_v16 = vld [vmem:[#allocation7 + $0x48] sm:$0xff]  }
  0xd4   :  { %v2854_v17 = vld [vmem:[#allocation5 + $0x608] ss:$16 sps:$4 sm:$0xff]  }
  0xd5   :  { %1419 = vmatpush1.bf16.msra.mxu0 %v2764_v19  ;;  %v2860_v18 = vld [vmem:[#allocation7 + $0x8] sm:$0xff]   ;;  %v2865_v19 = vld [vmem:[#allocation7 + $0xc0] sm:$0xff]  }
  0xd6   :  { %1589 = vmatpush1.bf16.msra.mxu1 %v2767_v20  ;;  %1420 = vmatprep.subr.bf16.mxu0 %v2772_v21  ;;  %v2861_v20 = vld [vmem:[#allocation7 + $0x50] sm:$0xff]  }
  0xd7   :  { %1590 = vmatprep.subr.bf16.mxu1 %v2775_v22  ;;  %v2862_v21 = vld [vmem:[#allocation7 + $0x10] sm:$0xff]   ;;  %v2863_v22 = vld [vmem:[#allocation7 + $0x58] sm:$0xff]  }
  0xd9   :  { %1421 = vmatpush1.bf16.msra.mxu0 %v2770_v23  ;;  %v2864_v23 = vld [vmem:[#allocation7 + $0x18] sm:$0xff]  }
  0xda   :  { %1591 = vmatpush1.bf16.msra.mxu1 %v2773_v24  ;;  %1422 = vmatprep.subr.bf16.mxu0 %v2778_v25  ;;  %v2867_v24 = vld [vmem:[#allocation7 + $0x60] sm:$0xff]  }
  0xdb   :  { %1592 = vmatprep.subr.bf16.mxu1 %v2781_v26  ;;  %v2866_v25 = vld [vmem:[#allocation7 + $0x80] sm:$0xff]  }
  0xdc   :  { %v2868_v26 = vld [vmem:[#allocation7 + $0x20] sm:$0xff]  }
  0xdd   :  { %1423 = vmatpush1.bf16.msra.mxu0 %v2776_v27  ;;  %v2869_v27 = vld [vmem:[#allocation7 + $0xc8] sm:$0xff]  }
  0xde   :  { %1593 = vmatpush1.bf16.msra.mxu1 %v2779_v28  ;;  %1424 = vmatprep.subr.bf16.mxu0 %v2784_v29  ;;  %v2905_v28 = vld [vmem:[#allocation2 + $0x18] ss:$28 sps:$4 sm:$0xff]  }
  0xdf   :  { %1594 = vmatprep.subr.bf16.mxu1 %v2787_v30 }
  0xe1   :  { %1425 = vmatpush1.bf16.msra.mxu0 %v2782_v31 }
  0xe2   :  { %1595 = vmatpush1.bf16.msra.mxu1 %v2785_v32  ;;  %1426 = vmatprep.subr.bf16.mxu0 %v2790_v33  ;;  %v2870_v32 = vld [vmem:[#allocation7 + $0x88] sm:$0xff]  }
  0xe3   :  { %1596 = vmatprep.subr.bf16.mxu1 %v2793_v34  ;;  %v2871_v33 = vld [vmem:[#allocation7 + $0x68] sm:$0xff]  }
  0xe4   :  { %v2872_v34 = vld [vmem:[#allocation7 + $0x28] sm:$0xff]  }
  0xe5   :  { %1427 = vmatpush1.bf16.msra.mxu0 %v2788_v35  ;;  %v2873_v35 = vld [vmem:[#allocation7 + $0xd0] sm:$0xff]  }
  0xe6   :  { %1597 = vmatpush1.bf16.msra.mxu1 %v2791_v36  ;;  %1428 = vmatprep.subr.bf16.mxu0 %v2796_v37  ;;  %v2874_v36 = vld [vmem:[#allocation7 + $0x90] sm:$0xff]  }
  0xe7   :  { %1598 = vmatprep.subr.bf16.mxu1 %v2799_v38  ;;  %v2875_v37 = vld [vmem:[#allocation7 + $0x70] sm:$0xff]  }
  0xe8   :  { %v2876_v38 = vld [vmem:[#allocation7 + $0x30] sm:$0xff]  }
  0xe9   :  { %1429 = vmatpush1.bf16.msra.mxu0 %v2794_v39  ;;  %v2877_v39 = vld [vmem:[#allocation7 + $0xd8] sm:$0xff]  }
  0xea   :  { %1599 = vmatpush1.bf16.msra.mxu1 %v2797_v40  ;;  %1430 = vmatprep.subr.bf16.mxu0 %v2802_v41  ;;  %v2878_v40 = vld [vmem:[#allocation7 + $0x98] sm:$0xff]  }
  0xeb   :  { %1600 = vmatprep.subr.bf16.mxu1 %v2805_v42  ;;  %v2879_v41 = vld [vmem:[#allocation7 + $0x78] sm:$0xff]  }
  0xec   :  { %v2880_v42 = vld [vmem:[#allocation7 + $0x38] sm:$0xff]  }
  0xed   :  { %1431 = vmatpush1.bf16.msra.mxu0 %v2800_v43  ;;  %v2881_v43 = vld [vmem:[#allocation7 + $0xe0] sm:$0xff]  }
  0xee   :  { %1601 = vmatpush1.bf16.msra.mxu1 %v2803_v44  ;;  %1432 = vmatprep.subr.bf16.mxu0 %v2808_v45  ;;  %v2882_v44 = vld [vmem:[#allocation7 + $0xa0] sm:$0xff]   ;;  %v2883_v45 = vld [vmem:[#allocation7 + $0xe8] sm:$0xff]  }
  0xef   :  { %1602 = vmatprep.subr.bf16.mxu1 %v2811_v46  ;;  %v2884_v46 = vld [vmem:[#allocation7 + $0xa8] sm:$0xff]  }
  0xf1   :  { %1433 = vmatpush1.bf16.msra.mxu0 %v2806_v47  ;;  %v2885_v47 = vld [vmem:[#allocation7 + $0xf0] sm:$0xff]  }
  0xf2   :  { %1603 = vmatpush1.bf16.msra.mxu1 %v2809_v48  ;;  %1434 = vmatprep.subr.bf16.mxu0 %v2814_v49  ;;  %v2886_v48 = vld [vmem:[#allocation7 + $0xb0] sm:$0xff]   ;;  %v2887_v49 = vld [vmem:[#allocation7 + $0xf8] sm:$0xff]  }
  0xf3   :  { %1604 = vmatprep.subr.bf16.mxu1 %v2817_v50  ;;  %v2888_v50 = vld [vmem:[#allocation7 + $0xb8] sm:$0xff]  }
  0xf5   :  { %1435 = vmatpush1.bf16.msra.mxu0 %v2812_v51  ;;  %v3035_v51 = vmov 0.0  }
  0xf6   :  { %1605 = vmatpush1.bf16.msra.mxu1 %v2815_v52  ;;  %1436 = vmatprep.subr.bf16.mxu0 %v2820_v53  ;;  %v289_v52 = vlaneseq }
  0xf7   :  { %1606 = vmatprep.subr.bf16.mxu1 %v2823_v54 }
  0xf8   :  { %v290_v53 = vshrl.u32 %v289_v52, 7 }
  0xf9   :  { %1437 = vmatpush1.bf16.msra.mxu0 %v2818_v55  ;;  %v287_v55 = vld [vmem:[%s3164_s2] sm:$0xf] }
  0xfa   :  { %1607 = vmatpush1.bf16.msra.mxu1 %v2821_v56  ;;  %1438 = vmatprep.subr.bf16.mxu0 %v2826_v57  ;;  %v291_v54 = vsub.s32 0, %v290_v53  ;;  %v295_v56 = vsub.s32 1, %v290_v53 }
  0xfb   :  { %1608 = vmatprep.subr.bf16.mxu1 %v2829_v58 }
  0xfc   :  { %v292_v57 = vrot.slane %v287_v55, %v291_v54  ;;  %v296_v58 = vrot.slane %v287_v55, %v295_v56 }
  0xfd   :  { %1439 = vmatpush1.bf16.msra.mxu0 %v2824_v59 }
  0xfe   :  { %1609 = vmatpush1.bf16.msra.mxu1 %v2827_v60  ;;  %1440 = vmatprep.subr.bf16.mxu0 %v2832_v61 }
  0xff   :  { %1610 = vmatprep.subr.bf16.mxu1 %v2835_v62 }
 0x101   :  { %1441 = vmatpush1.bf16.msra.mxu0 %v2830_v63 }
 0x102   :  { %1611 = vmatpush1.bf16.msra.mxu1 %v2833_v1  ;;  %1442 = vmatprep.subr.bf16.mxu0 %v2838_v2 }
 0x103   :  { %1612 = vmatprep.subr.bf16.mxu1 %v2841_v3 }
 0x105   :  { %1443 = vmatpush1.bf16.msra.mxu0 %v2836_v4 }
 0x106   :  { %1613 = vmatpush1.bf16.msra.mxu1 %v2839_v5  ;;  %1444 = vmatprep.subr.bf16.mxu0 %v2844_v6 }
 0x107   :  { %1614 = vmatprep.subr.bf16.mxu1 %v2847_v7 }
 0x109   :  { %1445 = vmatpush1.bf16.msra.mxu0 %v2842_v8 }
 0x10a   :  { %1615 = vmatpush1.bf16.msra.mxu1 %v2845_v9  ;;  %2432 = vmatprep.subr.bf16.mxu0 %v2857_v11 }
 0x10b   :  { %1616 = vmatprep.subr.bf16.mxu1 %v2853_v10 }
 0x10c   :  { %1447 = vmatmul.mubr.bf16.vlgmr.msra.gmra.mrb[0].mxu0 %v2848_v12 }
 0x10d   :  { %2433 = vmatpush3.bf16.msra.mxu0 %v2858_v14 }
 0x10e   :  { %1617 = vmatpush1.bf16.msra.mxu1 %v2851_v13  ;;  %2434 = vmatprep.subr.bf16.mxu0 %v2859_v16  ;;  %v299_v13 = vsub.s32 2, %v290_v53  ;;  %v2889_v16 = vld [vmem:[#allocation8] sm:$0xff]  }
 0x10f   :  { %1629 = vmatprep.subr.bf16.mxu1 %v2856_v15  ;;  %v303_v15 = vsub.s32 3, %v290_v53 }
 0x111   :  { %1619 = vmatmul.mubr.bf16.vlgmr.msra.gmra.mrb[4].mxu1 %v2848_v12  ;;  %2435 = vmatpush3.bf16.msra.mxu0 %v2860_v18  ;;  %v304_v18 = vrot.slane %v287_v55, %v303_v15 }
 0x112   :  { %1630 = vmatpush1.bf16.msra.mxu1 %v2854_v17  ;;  %1661 = vmatprep.mubr.bf16.mxu1 %v3034_v0  ;;  %v300_v17 = vrot.slane %v287_v55, %v299_v13 }
 0x113   :  { %2454 = vmatprep.subr.bf16.mxu1 %v2865_v19  ;;  %2436 = vmatprep.subr.bf16.mxu0 %v2861_v20  ;;  %v2890_v19 = vld [vmem:[#allocation8 + $0x8] sm:$0xff]  }
 0x115   :  { %2437 = vmatpush3.bf16.msra.mxu0 %v2862_v21 }
 0x116   :  { %2438 = vmatprep.subr.bf16.mxu0 %v2863_v22 }
 0x119   :  { %2439 = vmatpush3.bf16.msra.mxu0 %v2864_v23 }
 0x11a   :  { %2440 = vmatprep.subr.bf16.mxu0 %v2867_v24 }
 0x11d   :  { %2389 = vmatmul.mubr.msk.bf16.vlgmr.msra.gmra.mrb[4].mxu1 %vm1324_vm0, %v2905_v28  ;;  %2441 = vmatpush3.bf16.msra.mxu0 %v2868_v26 }
 0x11e   :  { %2455 = vmatpush3.bf16.msra.mxu1 %v2866_v25  ;;  %2442 = vmatprep.subr.bf16.mxu0 %v2871_v33  ;;  %v2891_v33 = vld [vmem:[#allocation8 + $0x10] sm:$0xff]  }
 0x11f   :  { %2456 = vmatprep.subr.bf16.mxu1 %v2869_v27 }
 0x121   :  { %2443 = vmatpush3.bf16.msra.mxu0 %v2872_v34  ;;  %v2892_v34 = vld [vmem:[#allocation8 + $0x18] sm:$0xff]  }
 0x122   :  { %2457 = vmatpush3.bf16.msra.mxu1 %v2870_v32  ;;  %2444 = vmatprep.subr.bf16.mxu0 %v2875_v37  ;;  %v2895_v37 = vld [vmem:[#allocation8 + $0x30] sm:$0xff]  }
 0x123   :  { %2458 = vmatprep.subr.bf16.mxu1 %v2873_v35  ;;  %v2893_v35 = vld [vmem:[#allocation8 + $0x20] sm:$0xff]  }
 0x124   :  { %v1491_v0 = vpop.f32.mrb[0].mxu1 }
 0x125   :  { %v1493_v29 = vpop.f32.mrb[1].mxu1  ;;  %2445 = vmatpush3.bf16.msra.mxu0 %v2876_v38  ;;  %v2896_v38 = vld [vmem:[#allocation8 + $0x38] sm:$0xff]  }
 0x126   :  { %v1495_v30 = vpop.f32.mrb[2].mxu1  ;;  %2459 = vmatpush3.bf16.msra.mxu1 %v2874_v36  ;;  %2446 = vmatprep.subr.bf16.mxu0 %v2879_v41  ;;  %v2894_v36 = vld [vmem:[#allocation8 + $0x28] sm:$0xff]  }
 0x127   :  { %v1497_v31 = vpop.f32.mrb[3].mxu1  ;;  %2460 = vmatprep.subr.bf16.mxu1 %v2877_v39 }
 0x129   :  { %2447 = vmatpush3.bf16.msra.mxu0 %v2880_v42 }
 0x12a   :  { %2461 = vmatpush3.bf16.msra.mxu1 %v2878_v40  ;;  %2485 = vmatprep.subr.bf16.mxu0 %v3035_v51 }
 0x12b   :  { %2462 = vmatprep.subr.bf16.mxu1 %v2881_v43 }
 0x12e   :  { %2463 = vmatpush3.bf16.msra.mxu1 %v2882_v44 }
 0x12f   :  { %2464 = vmatprep.subr.bf16.mxu1 %v2883_v45  ;;  %v2390_v45 = vld [vmem:[%s3166_s4] ss:$0 sm:$0xff]  ;;  %s3037_s4 = smov [#allocation10]  }
 0x132   :  { %2465 = vmatpush3.bf16.msra.mxu1 %v2884_v46 }
 0x133   :  { %2466 = vmatprep.subr.bf16.mxu1 %v2885_v47 }
 0x136   :  { %2467 = vmatpush3.bf16.msra.mxu1 %v2886_v48 }
 0x137   :  { %2468 = vmatprep.subr.bf16.mxu1 %v2887_v49 }
 0x13a   :  { %2469 = vmatpush3.bf16.msra.mxu1 %v2888_v50 }
 0x1df   :  { %v1448_v59 = vpop.f32.mrb[0].mxu0 }
 0x1e0   :  { %v2505_v60 = vadd.f32 %v1448_v59, %v292_v57  ;;  %v1450_v61 = vpop.f32.mrb[1].mxu0  ;;  %v2423_v59 = vld [vmem:[%s3168_s6] ss:$0 sm:$0xff]  ;;  %s2171_s6 = sshll.u32 %s3037_s4, 4  ;;  %s2172_s6 = int_to_ptr.vmem [resolvable:$true] %s2171_s6 }
 0x1e1   :  { %v2507_v62 = vadd.f32 %v1450_v61, %v296_v58  ;;  %v1452_v63 = vpop.f32.mrb[2].mxu0  ;;  %s2994_s9 = scalar_lea.vmem %s2172_s6, 256  ;;  %p2999_p5 = scmp.lt.s32.totalorder %s2172_s6, %s2172_s6 }
 0x1e2   :  { %v2506_v1 = vadd.f32 %v2505_v60, %v1491_v0  ;;  %v2509_v2 = vadd.f32 %v1452_v63, %v292_v57  ;;  %v1454_v3 = vpop.f32.mrb[3].mxu0  ;;  %p2995_p4 = scmp.ne.s32.totalorder %s2172_s6, %s2994_s9  ;;  %p3000_p6 = scmp.lt.s32.totalorder %s2994_s9, %s2994_s9 }
 0x1e3   :  { %v2508_v4 = vadd.f32 %v2507_v62, %v1493_v29  ;;  %v2511_v5 = vadd.f32 %v1454_v3, %v296_v58 }
 0x1e4   :  { %v2510_v6 = vadd.f32 %v2509_v2, %v1495_v30  ;;  %v1672_v8 = vmax.f32 %v2506_v1, 0.0  ;;  %p3001_p7 = por %p3000_p6, %p2999_p5 }
 0x1e5   :  { %v2512_v7 = vadd.f32 %v2511_v5, %v1497_v31  ;;  %v1673_v10 = vmax.f32 %v2508_v4, 0.0 }
 0x1e6   :  { %v1676_v9 = vmax.f32 %v2510_v6, 0.0  ;;  %p3002_p8 = pnand %p3001_p7, %p2995_p4 }
 0x1e7   :  { %v1677_v11 = vmax.f32 %v2512_v7, 0.0 }
 0x1e8   :  { %v1680_v12 = vpack.c.bf16 %v1676_v9, %v1672_v8 }
 0x1e9   :  { %v1681_v14 = vpack.c.bf16 %v1677_v11, %v1673_v10 }
 0x1eb   :  { %1979 = vmatprep.mubr.bf16.mxu0 %v1681_v14 }
 0x1ec   :  { %1980 = vmatmul.mubr.bf16.vlgmr.msra.gmra.mrb[4].mxu0 %v1680_v12 }
 0x1ed   :  { %2486 = vmatpush3.bf16.msra.mxu0 %v2889_v16  ;;  %2501 = vmatprep.mubr.msk.bf16.mxu0 %vm3036_vm1, %v3035_v51 }
 0x1ee   :  { %2487 = vmatprep.subr.bf16.mxu0 %v3035_v51 }
 0x1f0   :  { %v1663_v20 = vpop.f32.mrb[4].mxu1 }
 0x1f1   :  { %v2513_v21 = vadd.f32 %v1663_v20, %v300_v17  ;;  %v1665_v22 = vpop.f32.mrb[5].mxu1  ;;  %2488 = vmatpush3.bf16.msra.mxu0 %v2890_v19 }
 0x1f2   :  { %v2514_v23 = vadd.f32 %v1665_v22, %v304_v18  ;;  %v1667_v24 = vpop.f32.mrb[6].mxu1  ;;  %2489 = vmatprep.subr.bf16.mxu0 %v3035_v51 }
 0x1f3   :  { %v2515_v25 = vadd.f32 %v1667_v24, %v300_v17  ;;  %v1669_v26 = vpop.f32.mrb[7].mxu1  ;;  %v1674_v28 = vmax.f32 %v2513_v21, 0.0 }
 0x1f4   :  { %v2516_v27 = vadd.f32 %v1669_v26, %v304_v18  ;;  %v1675_v29 = vmax.f32 %v2514_v23, 0.0 }
 0x1f5   :  { %v1678_v0 = vmax.f32 %v2515_v25, 0.0  ;;  %2490 = vmatpush3.bf16.msra.mxu0 %v2891_v33 }
 0x1f6   :  { %v1679_v30 = vmax.f32 %v2516_v27, 0.0  ;;  %2491 = vmatprep.subr.bf16.mxu0 %v3035_v51 }
 0x1f7   :  { %v1682_v31 = vpack.c.bf16 %v1678_v0, %v1674_v28 }
 0x1f8   :  { %v1683_v32 = vpack.c.bf16 %v1679_v30, %v1675_v29 }
 0x1f9   :  { %2492 = vmatpush3.bf16.msra.mxu0 %v2892_v34 }
 0x1fa   :  { %2020 = vmatprep.mubr.bf16.mxu1 %v1683_v32  ;;  %2493 = vmatprep.subr.bf16.mxu0 %v3035_v51 }
 0x1fb   :  { %2021 = vmatmul.mubr.bf16.vlgmr.msra.gmra.mrb[8].mxu1 %v1682_v31 }
 0x1fd   :  { %2494 = vmatpush3.bf16.msra.mxu0 %v2893_v35 }
 0x1fe   :  { %2495 = vmatprep.subr.bf16.mxu0 %v3035_v51 }
 0x201   :  { %2496 = vmatpush3.bf16.msra.mxu0 %v2894_v36 }
 0x202   :  { %2497 = vmatprep.subr.bf16.mxu0 %v3035_v51 }
 0x205   :  { %2498 = vmatpush3.bf16.msra.mxu0 %v2895_v37 }
 0x206   :  { %2499 = vmatprep.subr.bf16.mxu0 %v3035_v51 }
 0x209   :  { %2500 = vmatpush3.bf16.msra.mxu0 %v2896_v38 }
 0x2bf   :  { %v2448_v39 = vpop.f32.mrb[4].mxu0 }
 0x2c0   :  { %v2449_v40 = vpop.f32.mrb[5].mxu0 }
 0x2c1   :  { %v2450_v41 = vadd.f32 %v2449_v40, %v2448_v39  ;;  %v2451_v42 = vpop.f32.mrb[6].mxu0 }
 0x2c2   :  { %v2452_v43 = vpop.f32.mrb[7].mxu0 }
 0x2c3   :  { %v2453_v44 = vadd.f32 %v2452_v43, %v2451_v42  ;;  %v1982_v48 = vadd.f32 %v2450_v41, %v2390_v45 }
 0x2c5   :  { %v1985_v53 = vadd.f32 %v2453_v44, %v2390_v45 }
 0x2ce   :  { %v2470_v46 = vpop.f32.mrb[8].mxu1 }
 0x2cf   :  { %v2471_v47 = vpop.f32.mrb[9].mxu1 }
 0x2d0   :  { %v2472_v49 = vadd.f32 %v2471_v47, %v2470_v46  ;;  %v2473_v50 = vpop.f32.mrb[10].mxu1 }
 0x2d1   :  { %v2474_v52 = vpop.f32.mrb[11].mxu1 }
 0x2d2   :  { %v2023_v54 = vadd.f32 %v2472_v49, %v1982_v48  ;;  %v2475_v55 = vadd.f32 %v2474_v52, %v2473_v50 }
 0x2d4   :  { %v2026_v51 = vadd.f32 %v2475_v55, %v1985_v53  ;;  %v2029_v56 = vmax.f32 %v2023_v54, 0.0 }
 0x2d6   :  { %v2030_v57 = vmax.f32 %v2026_v51, 0.0 }
 0x2d8   :  { %v2031_v58 = vpack.c.bf16 %v2030_v57, %v2029_v56 }
 0x2da   :  { %2502 = vmatmul.mubr.bf16.vlgmr.msra.gmra.mrb[8].mxu0 %v2031_v58 }
 0x3ad   :  { %v2137_v60 = vpop.f32.mrb[8].mxu0 }
 0x3ae   :  { %v2138_v61 = vadd.f32 %v2423_v59, %v2137_v60  ;;  %v2503_v62 = vpop.f32.mrb[9].mxu0 }
 0x3af   :  { %v2140_v63 = vpop.f32.mrb[10].mxu0 }
 0x3b0   :  { %2144 = vmax.xlane.f32.xlu0 %v2138_v61  ;;  %v2504_v1 = vpop.f32.mrb[11].mxu0  ;;  %v2141_v2 = vadd.f32 %v2423_v59, %v2140_v63 }
 0x3b4   :  { %2146 = vmax.xlane.f32.xlu0 %v2141_v2 }
 0x43d   :  { %v2145_v3 = vpop.xlane.xlu0 %2144 }
 0x43e   :  { %v2148_v4 = vsub.f32 %v2138_v61, %v2145_v3 }
 0x440   :  { %v2150_v5 = vmul.f32 1.442695, %v2148_v4 }
 0x441   :  { %v2147_v6 = vpop.xlane.xlu0 %2146 }
 0x442   :  { %v2149_v7 = vsub.f32 %v2141_v2, %v2147_v6  ;;  %2897 = vpow2.f32 %v2150_v5 }
 0x444   :  { %v2152_v8 = vmul.f32 1.442695, %v2149_v7 }
 0x446   :  { %2899 = vpow2.f32 %v2152_v8 }
 0x44c   :  { %v2898_v9 = vpop.eup %2897 }
 0x44d   :  { %2154 = vadd.xlane.f32.xlu1 %v2898_v9 }
 0x450   :  { %v2900_v10 = vpop.eup %2899 }
 0x451   :  { %2156 = vadd.xlane.f32.xlu1 %v2900_v10 }
 0x4da   :  { %v2155_v11 = vpop.xlane.xlu1 %2154 }
 0x4db   :  { %2901 = vlog2.f32 %v2155_v11 }
 0x4de   :  { %v2157_v12 = vpop.xlane.xlu1 %2156 }
 0x4df   :  { %2903 = vlog2.f32 %v2157_v12 }
 0x4e5   :  { %v2902_v13 = vpop.eup %2901 }
 0x4e6   :  { %v2159_v14 = vmul.f32 0.6931472, %v2902_v13 }
 0x4e8   :  { %v2162_v15 = vsub.f32 %v2148_v4, %v2159_v14 }
 0x4e9   :  { %v2904_v16 = vpop.eup %2903 }
 0x4ea   :  { %2164 = vst [vmem:[#allocation10] sm:$0xff] %v2162_v15  ;;  %v2161_v17 = vmul.f32 0.6931472, %v2904_v16 }
 0x4ec   :  { %v2163_v18 = vsub.f32 %v2149_v7, %v2161_v17 }
 0x4ee   :  { %2165 = vst [vmem:[#allocation10 + $0x8] sm:$0xff] %v2163_v18 }
 0x4ef   :  { %3005 = shalt.err (!%p3002_p8)
}
 0x4f0   :  { %s3006_s12 = scalar_lea.hbm %s3169_s7, 256 }
 0x4f1   :  { %p3007_p9 = scmp.ne.s32.totalorder %s3169_s7, %s3006_s12  ;;  %p3010_p10 = scmp.lt.u32.totalorder %s3006_s12, %s3169_s7 }
 0x4f3   :  { %p3012_p11 = pnand %p3010_p10, %p3007_p9 }
 0x4f5   :  { %3015 = shalt.err (!%p3012_p11)
}
 0x4f6   :  { %s3038_s16 = smov 128   ;;  %s3039_s17 = smov 8  }
 0x4f7   :  { %2177 = dma.vmem_to_hbm [thread:$0]  %s2172_s6, 256, %s3169_s7, [#allocation4], %s3038_s16, %s3038_s16, %s3039_s17  }
 0x4f8   :  { %3022 = dma.done.wait [#allocation4], 256  }
 0x4f9   :  { %3023 = vsyncadd [#allocation4], 4294967040 }
 0x4fa   :  { %2181 = vsyncpa [#allocation3], 1 }
 0x4fb   :  { %2182 = vsyncpa [#allocation6], 1 }
 0x4fc   :  { %2183 = vsyncpa [#allocation9], 1 }
 0x4fd   :  { %2184 = vsyncpa [#allocation4], 1 }

</bundles_post_ra>
